<compile_context>
chip_gen: v7x
topology: tpu7x:2x2x1
jax: 0.10.0
libtpu: 0.0.40
codegen_flags: <defaults>
</compile_context>

<pallas_src>
import jax
import jax.numpy as jnp
from jax.experimental import pallas as pl
from jax.experimental.pallas import tpu as pltpu


def _down_conv_kernel(xm_ref, xh_ref, w_ref, b_ref, o_ref):
    # xm_ref: (1, tho, Ws, C4) bf16 — main space-to-depth rows of this block
    # xh_ref: (1, 1,   Ws, C4) bf16 — halo row (first s2d row of the next block)
    # w_ref : (K, tcout)       bf16 — weights of the equivalent 2x2 conv, K = 4*C4
    # b_ref : (1, tcout)       f32  — bias row
    # o_ref : (1, tho, Wo, tcout)   — NHWC output block
    tho = xm_ref.shape[1]
    wo = xm_ref.shape[2] - 1
    c4 = xm_ref.shape[3]
    tcout = w_ref.shape[1]

    xm = xm_ref[0]                                            # (tho, Ws, C4)
    if tho > 1:
        xn = jnp.concatenate([xm[1:], xh_ref[0]], axis=0)     # rows shifted by +1
    else:
        xn = xh_ref[0]

    # Fused im2col of the 2x2 stride-1 conv: one operand, one MXU matmul.
    v = jnp.concatenate(
        [xm[:, :wo, :], xm[:, 1:wo + 1, :],
         xn[:, :wo, :], xn[:, 1:wo + 1, :]], axis=-1)          # (tho, Wo, 4*C4)
    v = v.reshape(tho * wo, 4 * c4)

    acc = jnp.dot(v, w_ref[...], preferred_element_type=jnp.float32)
    acc = acc + b_ref[...]                                     # (tho*Wo, tcout)
    o_ref[...] = acc.reshape(1, tho, wo, tcout).astype(o_ref.dtype)


def _round_up(x, m):
    return (x + m - 1) // m * m


def _pick_cout_tile(K, Cout, budget):
    """Tile Cout (multiples of 128) only when the (K, Cout) weight block would
    not comfortably fit in the per-step VMEM budget."""
    if 2 * K * Cout * 2 <= budget // 3 or Cout % 128 != 0:
        # TODO(synk): for huge Cin*Cout where Cout tiling alone is not enough,
        # add a K-reduction grid axis ('arbitrary', innermost) with an f32
        # VMEM scratch accumulator and pl.when init/finalize.
        return Cout
    tc = Cout
    for cand in range(Cout - 128, 0, -128):
        if Cout % cand == 0:
            tc = cand
            if 2 * K * cand * 2 <= budget // 3:
                break
    return tc


def _pick_row_tile(Ho, Wo, Ws, C4, tcout, budget, target_pixels):
    """Largest row tile (multiple of 8, or all of Ho) whose per-step VMEM
    footprint (double-buffered blocks + in-kernel operand/result) fits the
    budget, capped at ~target_pixels output pixels per step."""
    K = 4 * C4

    def step_bytes(t):
        x_in = 2 * t * _round_up(Ws, 8) * _round_up(C4, 128) * 2   # main block x2, bf16
        halo = 2 * 1 * _round_up(Ws, 8) * _round_up(C4, 128) * 2
        w = 2 * _round_up(K, 8) * _round_up(tcout, 128) * 2        # weight block x2
        out = 2 * t * _round_up(Wo, 8) * _round_up(tcout, 128) * 4  # out block x2, f32
        v_op = _round_up(t * Wo, 8) * _round_up(K, 128) * 2        # fused operand
        acc = _round_up(t * Wo, 8) * _round_up(tcout, 128) * 4     # f32 result
        return x_in + halo + w + out + v_op + acc

    if Ho <= 8:
        return Ho
    best = 8  # smallest legal tile; may exceed budget for extreme channel counts
    for t in list(range(8, Ho, 8)) + [Ho]:
        if step_bytes(t) > budget:
            break
        best = t
        if t * Wo >= target_pixels:
            break
    return best


def downsample(x, weight, bias, *, target_pixels=8192):
    """Forward of nn.Conv2d(Cin, Cout, kernel_size=3, stride=2, padding=1).

    x: (N, Cin, H, W) f32; weight: (Cout, Cin, 3, 3); bias: (Cout,).
    Returns (N, Cout, ceil(H/2), ceil(W/2)) in x.dtype (NCHW, PyTorch layout).
    """
    N, Cin, H, W = x.shape
    Cout = weight.shape[0]
    Ho = (H - 1) // 2 + 1
    Wo = (W - 1) // 2 + 1
    Ws = Wo + 1

    Cin_p = Cin + (Cin % 2)          # even channels -> clean bf16 packing
    C4 = 4 * Cin_p                   # channels of the space-to-depth layout
    K = 4 * C4                       # contraction dim of the fused matmul

    # ---- VMEM limit / per-step budget derived from the part we run on -----
    try:
        vmem_cap = int(getattr(pltpu.get_tpu_info(), "vmem_capacity_bytes",
                               64 * 1024 * 1024))
    except Exception:
        vmem_cap = 64 * 1024 * 1024  # v7x-sized conservative fallback
    vmem_limit = min(vmem_cap * 3 // 4, 100 * 1024 * 1024)
    budget = vmem_limit * 4 // 5

    tcout = _pick_cout_tile(K, Cout, budget)
    n_co = -(-Cout // tcout)

    tho = _pick_row_tile(Ho, Wo, Ws, C4, tcout, budget, target_pixels)
    nblk = -(-Ho // tho)
    # Make sure both v7x TensorCores get at least one 'parallel' tile.
    if N * n_co * nblk < 2 and Ho > 8:
        half = max(8, ((Ho + 1) // 2 + 7) // 8 * 8)
        if half < Ho:
            tho = half
            nblk = -(-Ho // tho)

    R = nblk * tho + 1               # s2d rows incl. the final halo row

    # ---- input prep: cast + NHWC + pad + space-to-depth (no halo gather) ---
    xh = jnp.transpose(x.astype(jnp.bfloat16), (0, 2, 3, 1))            # NHWC
    xp = jnp.pad(xh, ((0, 0),
                      (1, 2 * R - 1 - H),
                      (1, 2 * Ws - 1 - W),
                      (0, Cin_p - Cin)))                                 # (N, 2R, 2Ws, Cin_p)
    xs = xp.reshape(N, R, 2, Ws, 2, Cin_p)                               # [n, r, p, s, q, c]
    xs = jnp.transpose(xs, (0, 1, 3, 2, 4, 5)).reshape(N, R, Ws, C4)     # [n, r, s, (p,q,c)]

    # ---- weights: 3x3 -> (K, Cout) of the equivalent stride-1 2x2 conv ----
    wp = jnp.pad(weight.astype(jnp.float32),
                 ((0, 0), (0, Cin_p - Cin), (0, 1), (0, 1)))             # (Cout, Cin_p, 4, 4)
    wp = wp.reshape(Cout, Cin_p, 2, 2, 2, 2)                             # [co, c, di, p, dj, q]
    wk = jnp.transpose(wp, (2, 4, 3, 5, 1, 0)).reshape(K, Cout)          # [(di,dj,p,q,c), co]
    wk = wk.astype(jnp.bfloat16)
    b_row = bias.reshape(1, Cout).astype(jnp.float32)

    out_nhwc = pl.pallas_call(
        _down_conv_kernel,
        out_shape=jax.ShapeDtypeStruct((N, Ho, Wo, Cout), x.dtype),
        grid_spec=pltpu.PrefetchScalarGridSpec(
            num_scalar_prefetch=0,
            grid=(N, n_co, nblk),
            in_specs=[
                # main tho-row window of the space-to-depth input
                pl.BlockSpec((1, tho, Ws, C4), lambda n, co, b: (n, b, 0, 0)),
                # 1-row halo: the first row of the *next* block (same array)
                pl.BlockSpec((1, 1, Ws, C4),
                             lambda n, co, b: (n, (b + 1) * tho, 0, 0)),
                pl.BlockSpec((K, tcout), lambda n, co, b: (0, co)),
                pl.BlockSpec((1, tcout), lambda n, co, b: (0, co)),
            ],
            out_specs=pl.BlockSpec((1, tho, Wo, tcout),
                                   lambda n, co, b: (n, b, 0, co)),
        ),
        compiler_params=pltpu.CompilerParams(
            dimension_semantics=("parallel", "parallel", "parallel"),
            vmem_limit_bytes=int(vmem_limit),
        ),
    )(xs, xs, wk, b_row)

    # One pass over the (4x smaller) output restores PyTorch's NCHW contract.
    # TODO(synk): return NHWC directly if the downstream consumer accepts it.
    return jnp.transpose(out_nhwc, (0, 3, 1, 2))


if __name__ == "__main__":
    key = jax.random.PRNGKey(0)
    kx, kw, kb = jax.random.split(key, 3)

    N, Cin, H, W = 2, 4, 16, 16
    Cout = 8

    x = jax.random.normal(kx, (N, Cin, H, W), dtype=jnp.float32)
    weight = jax.random.normal(kw, (Cout, Cin, 3, 3), dtype=jnp.float32) * 0.1
    bias = jax.random.normal(kb, (Cout,), dtype=jnp.float32) * 0.1

    y = jax.block_until_ready(jax.jit(downsample)(x, weight, bias))

    # Reference: XLA conv on bf16-rounded inputs (the kernel computes
    # bf16 x bf16 with f32 accumulation), same semantics as
    # nn.Conv2d(kernel_size=3, stride=2, padding=1).
    xq = x.astype(jnp.bfloat16).astype(jnp.float32)
    wq = weight.astype(jnp.bfloat16).astype(jnp.float32)
    y_ref = jax.lax.conv_general_dilated(
        xq, wq, window_strides=(2, 2), padding=((1, 1), (1, 1)),
        dimension_numbers=("NCHW", "OIHW", "NCHW")) + bias.reshape(1, -1, 1, 1)

    assert y.shape == (N, Cout, (H + 1) // 2, (W + 1) // 2)
    assert jnp.allclose(y, y_ref, atol=1e-3, rtol=1e-3), \
        float(jnp.max(jnp.abs(y - y_ref)))
    print("KERNEL_OK")
</pallas_src>

<mosaic_0001>
module attributes {stable_mosaic.version = 11 : i64} {
  func.func @_down_conv_kernel(%arg0: i32, %arg1: i32, %arg2: i32, %arg3: memref<1x8x9x16xbf16, #tpu.memory_space<vmem>>, %arg4: memref<1x1x9x16xbf16, #tpu.memory_space<vmem>>, %arg5: memref<64x8xbf16, #tpu.memory_space<vmem>>, %arg6: memref<1x8xf32, #tpu.memory_space<vmem>>, %arg7: memref<1x8x8x8xf32, #tpu.memory_space<vmem>>) attributes {dimension_semantics = [#tpu.dimension_semantics<parallel>, #tpu.dimension_semantics<parallel>, #tpu.dimension_semantics<parallel>], iteration_bounds = array<i64: 2, 1, 1>, scalar_prefetch = 0 : i64, scratch_operands = 0 : i64, tpu.core_type = #tpu.core_type<tc>, window_params = [{transform_indices = @transform_0, window_bounds = array<i64: 1, 8, 9, 16>}, {transform_indices = @transform_1, window_bounds = array<i64: 1, 1, 9, 16>}, {transform_indices = @transform_2, window_bounds = array<i64: 64, 8>}, {transform_indices = @transform_3, window_bounds = array<i64: 1, 8>}, {transform_indices = @transform_4, window_bounds = array<i64: 1, 8, 8, 8>}]} {
    %c0 = arith.constant 0 : index
    %c0_0 = arith.constant 0 : index
    %c0_1 = arith.constant 0 : index
    %c0_2 = arith.constant 0 : index
    %0 = vector.load %arg3[%c0, %c0_0, %c0_1, %c0_2] : memref<1x8x9x16xbf16, #tpu.memory_space<vmem>>, vector<1x8x9x16xbf16>
    %1 = vector.shape_cast %0 : vector<1x8x9x16xbf16> to vector<8x9x16xbf16>
    %2 = vector.extract_strided_slice %1 {offsets = [1, 0, 0], sizes = [7, 9, 16], strides = [1, 1, 1]} : vector<8x9x16xbf16> to vector<7x9x16xbf16>
    %c0_3 = arith.constant 0 : index
    %c0_4 = arith.constant 0 : index
    %c0_5 = arith.constant 0 : index
    %c0_6 = arith.constant 0 : index
    %3 = vector.load %arg4[%c0_3, %c0_4, %c0_5, %c0_6] : memref<1x1x9x16xbf16, #tpu.memory_space<vmem>>, vector<1x1x9x16xbf16>
    %4 = vector.shape_cast %3 : vector<1x1x9x16xbf16> to vector<1x9x16xbf16>
    %5 = tpu.concatenate %2, %4 in 0 : vector<7x9x16xbf16>, vector<1x9x16xbf16> -> vector<8x9x16xbf16>
    %6 = vector.extract_strided_slice %1 {offsets = [0, 0, 0], sizes = [8, 8, 16], strides = [1, 1, 1]} : vector<8x9x16xbf16> to vector<8x8x16xbf16>
    %7 = vector.extract_strided_slice %1 {offsets = [0, 1, 0], sizes = [8, 8, 16], strides = [1, 1, 1]} : vector<8x9x16xbf16> to vector<8x8x16xbf16>
    %8 = vector.extract_strided_slice %5 {offsets = [0, 0, 0], sizes = [8, 8, 16], strides = [1, 1, 1]} : vector<8x9x16xbf16> to vector<8x8x16xbf16>
    %9 = vector.extract_strided_slice %5 {offsets = [0, 1, 0], sizes = [8, 8, 16], strides = [1, 1, 1]} : vector<8x9x16xbf16> to vector<8x8x16xbf16>
    %10 = tpu.concatenate %6, %7, %8, %9 in 2 : vector<8x8x16xbf16>, vector<8x8x16xbf16>, vector<8x8x16xbf16>, vector<8x8x16xbf16> -> vector<8x8x64xbf16>
    %11 = vector.shape_cast %10 : vector<8x8x64xbf16> to vector<64x64xbf16>
    %c0_7 = arith.constant 0 : index
    %c0_8 = arith.constant 0 : index
    %12 = vector.load %arg5[%c0_7, %c0_8] : memref<64x8xbf16, #tpu.memory_space<vmem>>, vector<64x8xbf16>
    %cst = arith.constant dense<0.000000e+00> : vector<64x8xf32>
    %13 = tpu.matmul %11, %12, %cst {dimension_numbers = #tpu.dot_dimension_numbers<[1], [0], [0], [1], [0, 0, 1, 1], [], []>} : vector<64x64xbf16>, vector<64x8xbf16>, vector<64x8xf32> -> vector<64x8xf32>
    %c0_9 = arith.constant 0 : index
    %c0_10 = arith.constant 0 : index
    %14 = vector.load %arg6[%c0_9, %c0_10] : memref<1x8xf32, #tpu.memory_space<vmem>>, vector<1x8xf32>
    %15 = vector.broadcast %14 : vector<1x8xf32> to vector<64x8xf32>
    %16 = arith.addf %13, %15 : vector<64x8xf32>
    %17 = vector.shape_cast %16 : vector<64x8xf32> to vector<1x8x8x8xf32>
    %c0_11 = arith.constant 0 : index
    %c0_12 = arith.constant 0 : index
    %c0_13 = arith.constant 0 : index
    %c0_14 = arith.constant 0 : index
    %18 = vector.load %arg7[%c0_11, %c0_12, %c0_13, %c0_14] : memref<1x8x8x8xf32, #tpu.memory_space<vmem>>, vector<1x8x8x8xf32>
    tpu.vector_store %arg7[%c0_11, %c0_12, %c0_13, %c0_14], %17 {strides = array<i32>} : memref<1x8x8x8xf32, #tpu.memory_space<vmem>>, vector<1x8x8x8xf32>,
    return
  }
  func.func @transform_0(%arg0: i32, %arg1: i32, %arg2: i32) -> (i32, i32, i32, i32) {
    %c0_i32 = arith.constant 0 : i32
    %c0_i32_0 = arith.constant 0 : i32
    %c0_i32_1 = arith.constant 0 : i32
    return %arg0, %arg2, %c0_i32, %c0_i32_0 : i32, i32, i32, i32
  }
  func.func @transform_1(%arg0: i32, %arg1: i32, %arg2: i32) -> (i32, i32, i32, i32) {
    %c1_i32 = arith.constant 1 : i32
    %0 = arith.addi %arg2, %c1_i32 : i32
    %c8_i32 = arith.constant 8 : i32
    %1 = arith.muli %0, %c8_i32 : i32
    %c0_i32 = arith.constant 0 : i32
    %c0_i32_0 = arith.constant 0 : i32
    %c0_i32_1 = arith.constant 0 : i32
    return %arg0, %1, %c0_i32, %c0_i32_0 : i32, i32, i32, i32
  }
  func.func @transform_2(%arg0: i32, %arg1: i32, %arg2: i32) -> (i32, i32) {
    %c0_i32 = arith.constant 0 : i32
    %c0_i32_0 = arith.constant 0 : i32
    return %c0_i32, %arg1 : i32, i32
  }
  func.func @transform_3(%arg0: i32, %arg1: i32, %arg2: i32) -> (i32, i32) {
    %c0_i32 = arith.constant 0 : i32
    %c0_i32_0 = arith.constant 0 : i32
    return %c0_i32, %arg1 : i32, i32
  }
  func.func @transform_4(%arg0: i32, %arg1: i32, %arg2: i32) -> (i32, i32, i32, i32) {
    %c0_i32 = arith.constant 0 : i32
    %c0_i32_0 = arith.constant 0 : i32
    return %arg0, %arg2, %c0_i32, %arg1 : i32, i32, i32, i32
  }
}

</mosaic_0001>

<bundles_post_ra>
// kernel: downsample.1
= control target key start
LH: loop header
LB: loop body
LE: loop exit
PB: predicated region body
PF: predicated region fallthrough
CT: control target
= control target key end

     0   :  { %s1079_s15 = smov 0   ;;  %s1081_s16 = smov 0   ;;  %s1262_s0 = inlined_call_operand.vmem [shape: bf16[2,9,9,16], index: 0, kind: input, shape index: {}, may-alias: {0,1}]   ;;  %s1263_s1 = inlined_call_operand.vmem [shape: bf16[2,9,9,16], index: 1, kind: input, shape index: {}, may-alias: {0,1}]   ;;  %s1264_s2 = inlined_call_operand.vmem [shape: bf16[64,8], index: 2, kind: input, shape index: {}]   ;;  %s1265_s3 = inlined_call_operand.vmem [shape: f32[1,8], index: 3, kind: input, shape index: {}]   ;;  %s1266_s4 = inlined_call_operand.vmem [shape: f32[2,8,8,8], index: 4, kind: output, shape index: {}]  }
   0x1   :  { %s1083_s17 = smov 0  }
   0x2 LB: > { %s33_s18 = sadd.s32 1, %s1045_s16  ;;  %p904_p0 = scmp.ge.s32.totalorder %s1049_s17, 1  ;;  %s1049_s17 = sphi %s1083_s17, %s14_s17   ;;  %s1045_s16 = sphi %s1081_s16, %s1268_s16   ;;  %s1041_s15 = sphi %s1079_s15, %s1267_s15  }
   0x3   : > { %p35_p1 = scmp.ge.s32.totalorder %s33_s18, 2  ;;  %p244_p2 = scmp.lt.s32.totalorder %s1049_s17, 3 }
   0x5   : > { %s1270_s18 = smov (%p35_p1, %s33_s18), 0  ;;  %p245_p3 = pnand %p904_p0, %p244_p2 }
   0x6   : > { %p311_p4 = scmp.lt.s32.totalorder (!%p245_p3), %s1041_s15, 1  ;;  %s1051_s23 = smov (!%p245_p3), 32   ;;  %v1023_v57 = vld [vmem:[%s1264_s2] sm:$0xff] (!%p245_p3)   ;;  %v1024_v60 = vld [vmem:[%s1264_s2 + $0x8] sm:$0xff] (!%p245_p3)   ;;  %v1025_v63 = vld [vmem:[%s1264_s2 + $0x10] sm:$0xff] (!%p245_p3)   ;;  %vm542_vm0 = vcmask (!%p245_p3), 130048  }
   0x7   : > { %248 = sbr.rel (%p245_p3) target bundleno = 405 (0x195), region = 36  ;;  %s1052_s24 = smov (!%p245_p3), 16   ;;  %952 = vmatprep.subr.bf16.mxu0 (!%p245_p3), %v1023_v57  ;;  %968 = vmatprep.subr.bf16.mxu1 (!%p245_p3), %v1023_v57  ;;  %vm567_vm1 = vcmask (!%p245_p3), 261120   ;;  %vm584_vm2 = vcmask (!%p245_p3), 392192   ;;  %vm660_vm3 = vcmask (!%p245_p3), 523264   ;;  %vm738_vm4 = vcmask (!%p245_p3), 64512  }
   0x8   : > { %953 = vmatpush3.bf16.msra.mxu0 (!%p245_p3), %v1023_v57  ;;  %972 = vmatpush3.bf16.msra.mxu1 (!%p245_p3), %v1023_v57  ;;  %s1053_s11 = smov (!%p245_p3), 48  }
   0x9   : > { %954 = vmatprep.subr.bf16.mxu0 (!%p245_p3), %v1024_v60  ;;  %969 = vmatprep.subr.bf16.mxu1 (!%p245_p3), %v1024_v60 }
   0xc   : > { %955 = vmatpush3.bf16.msra.mxu0 (!%p245_p3), %v1024_v60  ;;  %973 = vmatpush3.bf16.msra.mxu1 (!%p245_p3), %v1024_v60 }
   0xd   : > { %956 = vmatprep.subr.bf16.mxu0 (!%p245_p3), %v1025_v63  ;;  %970 = vmatprep.subr.bf16.mxu1 (!%p245_p3), %v1025_v63 }
   0xe   : > { %s1272_s15 = smov (!%p311_p4, %s1041_s15), 1 }
   0xf   : > { %s976_s19 = smul.u32 72, %s1272_s15  ;;  %s943_s12 = sshll.u32 %s1272_s15, 6 }
  0x10   : > { %957 = vmatpush3.bf16.msra.mxu0 %v1025_v63  ;;  %974 = vmatpush3.bf16.msra.mxu1 %v1025_v63  ;;  %s357_s21 = scalar_lea.vmem %s1266_s4, %s943_s12 }
  0x11   : > { %s1105_s22 = scalar_lea.vmem %s1262_s0, %s976_s19  ;;  %s942_s27 = sadd.s32 64, %s976_s19 }
  0x12   : > { %v1108_v0 = vld [vmem:[%s1105_s22 + $0x10] sm:$0xf]  ;;  %v365_v1 = vld [vmem:[%s1105_s22 + $0x14] sm:$0x1]  ;;  %v1112_v2 = vld [vmem:[%s1105_s22 + $0x8] sm:$0xf]  ;;  %s336_s6 = scalar_lea.vmem %s1263_s1, %s942_s27 }
  0x13   : > { %v918_v3 = vcombine.low %v1108_v0, %v1108_v0  ;;  %v363_v4 = vld [vmem:[%s1105_s22 + $0xc] sm:$0x1]  ;;  %v917_v5 = vcombine.low %v1112_v2, %v1112_v2  ;;  %v1120_v6 = vld [vmem:[%s1105_s22 + $0x20] sm:$0xf]  ;;  %v369_v7 = vld [vmem:[%s1105_s22 + $0x24] sm:$0x1]  ;;  %v911_v8 = vcombine.low %v1108_v0, %v365_v1 }
  0x14   : > { %v910_v9 = vcombine.low %v1112_v2, %v363_v4  ;;  %v913_v10 = vcombine.low %v1120_v6, %v369_v7  ;;  %v1127_v11 = vld [vmem:[%s1105_s22] sm:$0xf]  ;;  %v361_v12 = vld [vmem:[%s1105_s22 + $0x4] sm:$0x1]  ;;  %v1131_v13 = vld [vmem:[%s1105_s22 + $0x28] sm:$0xf]  ;;  %v920_v62 = vcombine.low %v1120_v6, %v1120_v6 }
  0x15   : > { %502 = vrot.lane.b32.xlu1 %v918_v3, %s1051_s23  ;;  %500 = vrot.lane.b32.xlu0 %v917_v5, %s1051_s23  ;;  %v909_v14 = vcombine.low %v1127_v11, %v361_v12  ;;  %v371_v15 = vld [vmem:[%s1105_s22 + $0x2c] sm:$0x1]  ;;  %v1138_v16 = vld [vmem:[%s1105_s22 + $0x18] sm:$0xf]  ;;  %v435_v29 = vshll.u32 %v911_v8, 16  ;;  %v433_v47 = vshrl.u32 %v911_v8, 16  ;;  %v921_v61 = vcombine.low %v1131_v13, %v1131_v13 }
  0x16   : > { %v447_v17 = vshrl.u32 %v913_v10, 16  ;;  %v449_v18 = vshll.u32 %v913_v10, 16  ;;  %v914_v19 = vcombine.low %v1131_v13, %v371_v15  ;;  %v367_v20 = vld [vmem:[%s1105_s22 + $0x1c] sm:$0x1]  ;;  %v428_v23 = vshll.u32 %v910_v9, 16 }
  0x17   : > { %v419_v21 = vshrl.u32 %v909_v14, 16  ;;  %v421_v22 = vshll.u32 %v909_v14, 16  ;;  %v912_v24 = vcombine.low %v1138_v16, %v367_v20  ;;  %v1144_v25 = vld [vmem:[%s1105_s22 + $0x38] sm:$0xf]  ;;  %v375_v30 = vld [vmem:[%s1105_s22 + $0x3c] sm:$0x1]  ;;  %v919_v1 = vcombine.low %v1138_v16, %v1138_v16 }
  0x18   : > { %v451_v26 = vrot.slane %v449_v18, 1  ;;  %v454_v27 = vshrl.u32 %v914_v19, 16  ;;  %v456_v28 = vshll.u32 %v914_v19, 16  ;;  %v426_v32 = vshrl.u32 %v910_v9, 16  ;;  %v1148_v35 = vld [vmem:[%s1105_s22 + $0x30] sm:$0xf] }
  0x19   : > { %v423_v31 = vrot.slane %v421_v22, 1  ;;  %v430_v33 = vrot.slane %v428_v23, 1  ;;  %v442_v34 = vshll.u32 %v912_v24, 16  ;;  %v916_v38 = vcombine.low %v1144_v25, %v375_v30  ;;  %v373_v39 = vld [vmem:[%s1105_s22 + $0x34] sm:$0x1]  ;;  %v1026_v5 = vld [vmem:[%s1264_s2 + $0x18] sm:$0xff]  }
  0x1a   : > { %v1150_v36 = vor.u32 %v451_v26, %v447_v17  ;;  %v458_v37 = vrot.slane %v456_v28, 1  ;;  %v915_v41 = vcombine.low %v1148_v35, %v373_v39  ;;  %v440_v43 = vshrl.u32 %v912_v24, 16  ;;  %v376_v3 = vld [vmem:[%s336_s6] sm:$0xf]  ;;  %v377_v7 = vld [vmem:[%s336_s6 + $0x4] sm:$0x1]  ;;  %958 = vmatprep.subr.bf16.mxu0 %v1026_v5  ;;  %971 = vmatprep.subr.bf16.mxu1 %v1026_v5 }
  0x1b   : > { %v424_v40 = vor.u32 %v423_v31, %v419_v21  ;;  %v444_v44 = vrot.slane %v442_v34, 1  ;;  %v470_v45 = vshll.u32 %v916_v38, 16  ;;  %v431_v46 = vor.u32 %v430_v33, %v426_v32  ;;  %959 = vmatpush3.bf16.msra.mxu0 %v1026_v5  ;;  %975 = vmatpush3.bf16.msra.mxu1 %v1026_v5 }
  0x1c   : > { %482 = vrot.lane.b32.xlu1 %v1150_v36, %s1052_s24  ;;  %v1157_v42 = vor.u32 %v458_v37, %v454_v27  ;;  %v437_v48 = vrot.slane %v435_v29, 1  ;;  %v463_v49 = vshll.u32 %v915_v41, 16  ;;  %v468_v51 = vshrl.u32 %v916_v38, 16 }
  0x1d   : > { %474 = vrot.lane.b32.xlu0 %v424_v40, %s1052_s24  ;;  %v445_v50 = vor.u32 %v444_v44, %v440_v43  ;;  %v472_v52 = vrot.slane %v470_v45, 1  ;;  %v461_v54 = vshrl.u32 %v915_v41, 16  ;;  %v922_v59 = vcombine.low %v1148_v35, %v1148_v35 }
  0x1e   : > { %v438_v53 = vor.u32 %v437_v48, %v433_v47  ;;  %v465_v55 = vrot.slane %v463_v49, 1  ;;  %v924_v4 = vcombine.low %v376_v3, %v376_v3  ;;  %v923_v8 = vcombine.low %v1144_v25, %v1144_v25 }
  0x1f   : > { %v473_v56 = vor.u32 %v472_v52, %v468_v51  ;;  %v925_v9 = vcombine.low %v376_v3, %v377_v7 }
  0x20   : > { %484 = vrot.lane.b32.xlu1 %v1157_v42, %s1052_s24  ;;  %v466_v58 = vor.u32 %v465_v55, %v461_v54 }
  0x21   : > { %476 = vrot.lane.b32.xlu0 %v431_v46, %s1052_s24  ;;  %v522_v10 = vshll.u32 %v925_v9, 16  ;;  %v520_v12 = vshrl.u32 %v925_v9, 16 }
  0x23   : > { %v524_v14 = vrot.slane %v522_v10, 1 }
  0x24   : > { %480 = vrot.lane.b32.xlu1 %v445_v50, %s1052_s24 }
  0x25   : > { %478 = vrot.lane.b32.xlu0 %v438_v53, %s1052_s24  ;;  %v525_v15 = vor.u32 %v524_v14, %v520_v12 }
  0x28   : > { %488 = vrot.lane.b32.xlu1 %v473_v56, %s1052_s24 }
  0x29   : > { %486 = vrot.lane.b32.xlu0 %v466_v58, %s1052_s24 }
  0x2c   : > { %510 = vrot.lane.b32.xlu1 %v922_v59, %s1051_s23 }
  0x2d   : > { %508 = vrot.lane.b32.xlu0 %v921_v61, %s1051_s23 }
  0x30   : > { %506 = vrot.lane.b32.xlu1 %v920_v62, %s1051_s23 }
  0x31   : > { %504 = vrot.lane.b32.xlu0 %v919_v1, %s1051_s23 }
  0x34   : > { %514 = vrot.lane.b32.xlu1 %v924_v4, %s1051_s23 }
  0x35   : > { %512 = vrot.lane.b32.xlu0 %v923_v8, %s1051_s23 }
  0x38   : > { %528 = vrot.lane.b32.xlu1 %v438_v53, %s1053_s11 }
  0x39   : > { %526 = vrot.lane.b32.xlu0 %v431_v46, %s1053_s11 }
  0x3c   : > { %536 = vrot.lane.b32.xlu1 %v466_v58, %s1053_s11 }
  0x3d   : > { %534 = vrot.lane.b32.xlu0 %v1157_v42, %s1053_s11 }
  0x40   : > { %532 = vrot.lane.b32.xlu1 %v1150_v36, %s1053_s11 }
  0x41   : > { %530 = vrot.lane.b32.xlu0 %v445_v50, %s1053_s11 }
  0x44   : > { %540 = vrot.lane.b32.xlu1 %v525_v15, %s1053_s11 }
  0x45   : > { %538 = vrot.lane.b32.xlu0 %v473_v56, %s1053_s11 }
  0x87   : > { %v503_v17 = vpop.permute.xlu1 %502  ;;  %v501_v18 = vpop.permute.xlu0 %500 }
  0x8e   : > { %v483_v19 = vpop.permute.xlu1 %482 }
  0x8f   : > { %v475_v20 = vpop.permute.xlu0 %474 }
  0x90   : > { %v545_v36 = vsel %vm542_vm0, %v1127_v11, %v475_v20  ;;  %v557_v11 = vsel %vm542_vm0, %v1120_v6, %v483_v19 }
  0x91   : > { %v569_v40 = vsel %vm567_vm1, %v545_v36, %v501_v18 }
  0x92   : > { %v485_v21 = vpop.permute.xlu1 %484 }
  0x93   : > { %v477_v22 = vpop.permute.xlu0 %476 }
  0x94   : > { %v548_v33 = vsel %vm542_vm0, %v1112_v2, %v477_v22  ;;  %v560_v2 = vsel %vm542_vm0, %v1131_v13, %v485_v21 }
  0x95   : > { %v571_v38 = vsel %vm567_vm1, %v548_v33, %v503_v17 }
  0x96   : > { %v481_v23 = vpop.permute.xlu1 %480 }
  0x97   : > { %v479_v24 = vpop.permute.xlu0 %478  ;;  %v554_v50 = vsel %vm542_vm0, %v1138_v16, %v481_v23 }
  0x98   : > { %v551_v51 = vsel %vm542_vm0, %v1108_v0, %v479_v24 }
  0x9a   : > { %v489_v26 = vpop.permute.xlu1 %488 }
  0x9b   : > { %v487_v27 = vpop.permute.xlu0 %486  ;;  %v566_v16 = vsel %vm542_vm0, %v1144_v25, %v489_v26  ;;  %v926_v25 = vld [vmem:[%s1265_s3] ss:$0 sm:$0xff] }
  0x9c   : > { %v563_v0 = vsel %vm542_vm0, %v1148_v35, %v487_v27 }
  0x9e   : > { %v511_v28 = vpop.permute.xlu1 %510 }
  0x9f   : > { %v509_v29 = vpop.permute.xlu0 %508  ;;  %v579_v44 = vsel %vm567_vm1, %v560_v2, %v511_v28 }
  0xa0   : > { %v577_v46 = vsel %vm567_vm1, %v557_v11, %v509_v29 }
  0xa2   : > { %v507_v30 = vpop.permute.xlu1 %506 }
  0xa3   : > { %v505_v31 = vpop.permute.xlu0 %504  ;;  %v575_v6 = vsel %vm567_vm1, %v554_v50, %v507_v30 }
  0xa4   : > { %v573_v53 = vsel %vm567_vm1, %v551_v51, %v505_v31 }
  0xa6   : > { %v515_v32 = vpop.permute.xlu1 %514 }
  0xa7   : > { %v513_v34 = vpop.permute.xlu0 %512  ;;  %v583_v58 = vsel %vm567_vm1, %v566_v16, %v515_v32 }
  0xa8   : > { %v581_v60 = vsel %vm567_vm1, %v563_v0, %v513_v34 }
  0xaa   : > { %v529_v37 = vpop.permute.xlu1 %528 }
  0xab   : > { %v588_v39 = vsel %vm584_vm2, %v571_v38, %v529_v37  ;;  %v527_v41 = vpop.permute.xlu0 %526 }
  0xac   : > { %v586_v42 = vsel %vm584_vm2, %v569_v40, %v527_v41 }
  0xad   : > { %v927_v43 = vcombine.low %v586_v42, %v588_v39 }
  0xae   : > { %v537_v45 = vpop.permute.xlu1 %536 }
  0xaf   : > { %v596_v47 = vsel %vm584_vm2, %v579_v44, %v537_v45  ;;  %960 = vmatprep.mubr.msk.bf16.mxu0 %vm660_vm3, %v927_v43  ;;  %v535_v48 = vpop.permute.xlu0 %534 }
  0xb0   : > { %v594_v49 = vsel %vm584_vm2, %v577_v46, %v535_v48 }
  0xb1   : > { %v929_v13 = vcombine.low %v594_v49, %v596_v47 }
  0xb2   : > { %v533_v52 = vpop.permute.xlu1 %532 }
  0xb3   : > { %v592_v54 = vsel %vm584_vm2, %v575_v6, %v533_v52  ;;  %964 = vmatprep.mubr.msk.bf16.mxu1 %vm660_vm3, %v929_v13  ;;  %v531_v55 = vpop.permute.xlu0 %530 }
  0xb4   : > { %v590_v56 = vsel %vm584_vm2, %v573_v53, %v531_v55 }
  0xb5   : > { %v928_v57 = vcombine.low %v590_v56, %v592_v54 }
  0xb6   : > { %v541_v59 = vpop.permute.xlu1 %540 }
  0xb7   : > { %v600_v61 = vsel %vm584_vm2, %v583_v58, %v541_v59  ;;  %961 = vmatmul.mubr.msk.bf16.vlgmr.msra.gmra.mrb[0].mxu0 %vm660_vm3, %v928_v57  ;;  %v539_v62 = vpop.permute.xlu0 %538 }
  0xb8   : > { %v598_v63 = vsel %vm584_vm2, %v581_v60, %v539_v62 }
  0xb9   : > { %v930_v1 = vcombine.low %v598_v63, %v600_v61 }
  0xbb   : > { %965 = vmatmul.mubr.msk.bf16.vlgmr.msra.gmra.mrb[0].mxu1 %vm660_vm3, %v930_v1 }
 0x18a   : > { %v962_v35 = vpop.f32.mrb[0].mxu0 }
 0x18b   : > { %v716_v3 = vadd.f32 %v962_v35, %v926_v25  ;;  %v707_v4 = vpop.f32.mrb[1].mxu0 }
 0x18c   : > { %v708_v5 = vadd.f32 %v926_v25, %v707_v4  ;;  %v963_v7 = vpop.f32.mrb[2].mxu0 }
 0x18d   : > { %741 = vst.msk [vmem:[%s357_s21 + $0x10] sm:$0xff] %vm738_vm4, %v716_v3  ;;  %v719_v8 = vadd.f32 %v963_v7, %v926_v25  ;;  %v710_v9 = vpop.f32.mrb[3].mxu0 }
 0x18e   : > { %739 = vst.msk [vmem:[%s357_s21] sm:$0xff] %vm738_vm4, %v708_v5  ;;  %v711_v10 = vadd.f32 %v926_v25, %v710_v9  ;;  %v966_v12 = vpop.f32.mrb[0].mxu1 }
 0x18f   : > { %742 = vst.msk [vmem:[%s357_s21 + $0x18] sm:$0xff] %vm738_vm4, %v719_v8  ;;  %v732_v14 = vadd.f32 %v966_v12, %v926_v25  ;;  %v723_v15 = vpop.f32.mrb[1].mxu1 }
 0x190   : > { %740 = vst.msk [vmem:[%s357_s21 + $0x8] sm:$0xff] %vm738_vm4, %v711_v10  ;;  %v724_v17 = vadd.f32 %v926_v25, %v723_v15  ;;  %v967_v18 = vpop.f32.mrb[2].mxu1 }
 0x191   : > { %745 = vst.msk [vmem:[%s357_s21 + $0x30] sm:$0xff] %vm738_vm4, %v732_v14  ;;  %v735_v19 = vadd.f32 %v967_v18, %v926_v25  ;;  %v726_v20 = vpop.f32.mrb[3].mxu1 }
 0x192   : > { %743 = vst.msk [vmem:[%s357_s21 + $0x20] sm:$0xff] %vm738_vm4, %v724_v17  ;;  %v727_v21 = vadd.f32 %v926_v25, %v726_v20 }
 0x193   : > { %746 = vst.msk [vmem:[%s357_s21 + $0x38] sm:$0xff] %vm738_vm4, %v735_v19 }
 0x194   : > { %744 = vst.msk [vmem:[%s357_s21 + $0x28] sm:$0xff] %vm738_vm4, %v727_v21 }
 0x195 PF: > { %s14_s17 = sadd.s32 1, %s1049_s17   ;;  %s1267_s15 = smov %s1045_s16 }
 0x196   : > { %p11_p5 = scmp.ge.s32.totalorder %s14_s17, 4   ;;  %s1268_s16 = smov %s1270_s18 }
 0x198   :  { %13 = sbr.rel (!%p11_p5) target bundleno = 2 (0x2), region = 75 }

</bundles_post_ra>
